<compile_context>
chip_gen: v6e
topology: v6e:2x2x1
jax: 0.10.0
libtpu: 0.0.40
codegen_flags: <defaults>
</compile_context>

<pallas_src>
import functools

import jax
import jax.numpy as jnp
from jax import lax
from jax.experimental import pallas as pl
from jax.experimental.pallas import tpu as pltpu


# ------------------------------ Pallas kernel ------------------------------- #

def _residual_group_kernel(w_img, x_ref, w_ref, m_ref, o_ref, act_ref, col_ref):
    """One (image, layer) grid step.

    w_img:   static image width (Python int) for the flat tap offsets
    x_ref:   (1, C, S)    group input (residual branch), resident across layers
    w_ref:   (1, C, 9C)   this layer's weights (bf16), streamed per grid step
    m_ref:   (9, 1, S)    per-tap border-validity masks (1.0 / 0.0)
    o_ref:   (1, C, S)    group output, written only at the last layer
    act_ref: (C, S)       VMEM f32 scratch: current activation (lane-dense)
    col_ref: (9C, S)      VMEM f32 scratch: im2col slab for the merged matmul
    """
    l = pl.program_id(1)
    n_layers = pl.num_programs(1)
    C = act_ref.shape[0]
    S = act_ref.shape[1]

    # Layer 0: stage this image's activation into VMEM (dense (C, S) copy).
    @pl.when(l == 0)
    def _():
        act_ref[...] = x_ref[0].astype(act_ref.dtype)

    act = act_ref[...]                                   # (C, S) f32

    # Build the 9-tap im2col slab: tap (kh, kw) needs act[:, p + d] with
    # d = (kh-1)*W + (kw-1); generated with a lane roll (XLU) and zeroed at the
    # image borders by the precomputed masks (this is the conv's zero padding).
    for kh in range(3):
        for kw in range(3):
            t = kh * 3 + kw
            d = (kh - 1) * w_img + (kw - 1)
            if d == 0:
                tap = act                                # centre tap, always valid
            else:
                tap = pltpu.roll(act, shift=(-d) % S, axis=1) * m_ref[t]
            col_ref[t * C:(t + 1) * C, :] = tap          # sublane-aligned store

    # One merged MXU contraction per layer (K = 9*C): bf16 operands, f32 acc.
    acc = jnp.dot(w_ref[0], col_ref[...].astype(jnp.bfloat16),
                  preferred_element_type=jnp.float32)    # (C, S) f32, lane-dense

    @pl.when(l < n_layers - 1)
    def _():
        act_ref[...] = acc                               # stays in VMEM for next layer

    @pl.when(l == n_layers - 1)
    def _():
        # Fused residual add + ReLU; single lane-dense HBM writeback per image.
        out = jnp.maximum(acc + x_ref[0].astype(jnp.float32), 0.0)
        o_ref[0] = out.astype(o_ref.dtype)


# --------------------------------- Wrapper ----------------------------------- #

def residual_group_forward(x_nchw, weights_oihw):
    """ResidualGroup.forward: res = conv_L(...conv_1(x)...); relu(res + x).

    x_nchw:       (N, C, H, W)          PyTorch NCHW input
    weights_oihw: list of (C, C, 3, 3)  PyTorch OIHW conv weights (bias-free)
    """
    N, C, H, W = x_nchw.shape
    L = len(weights_oihw)
    S = H * W
    # TODO(synk): pltpu.roll along the lane axis wants S = H*W to be a multiple
    # of 128 (true for the SR target 360x640 and this demo); pad W otherwise.

    # Free reshape, no transpose: channels on sublanes, flat spatial on lanes.
    x = x_nchw.reshape(N, C, S)

    # Weights: (L, O, I, 3, 3) -> (L, O, 3, 3, I) -> (L, O, 9*I) so column
    # (kh*3+kw)*C + c matches the im2col row layout.  bf16 for the MXU.
    w = jnp.stack(weights_oihw, axis=0)
    w = jnp.transpose(w, (0, 1, 3, 4, 2)).reshape(L, C, 9 * C).astype(jnp.bfloat16)

    # Per-tap border-validity masks (the conv's zero padding), built once.
    hh = jnp.arange(H)[:, None]
    ww = jnp.arange(W)[None, :]
    masks = []
    for kh in range(3):
        for kw in range(3):
            dh, dw = kh - 1, kw - 1
            valid = ((hh + dh >= 0) & (hh + dh < H) &
                     (ww + dw >= 0) & (ww + dw < W))
            masks.append(valid.reshape(1, S))
    masks = jnp.stack(masks, axis=0).astype(jnp.float32)      # (9, 1, S)

    # TODO(synk): for full-resolution frames / larger n_feat (esp. v7x's 64 MiB
    # VMEM) add halo'd H-strip tiling as an extra "parallel" grid axis so N=1
    # inference still feeds both v7x TensorCores.
    kernel = functools.partial(_residual_group_kernel, W)
    out = pl.pallas_call(
        kernel,
        out_shape=jax.ShapeDtypeStruct((N, C, S), x.dtype),
        grid=(N, L),
        in_specs=[
            pl.BlockSpec((1, C, S), lambda n, l: (n, 0, 0)),      # residual, resident over l
            pl.BlockSpec((1, C, 9 * C), lambda n, l: (l, 0, 0)),  # per-layer streamed weights
            pl.BlockSpec((9, 1, S), lambda n, l: (0, 0, 0)),      # tap masks, fetched once
        ],
        out_specs=pl.BlockSpec((1, C, S), lambda n, l: (n, 0, 0)),
        scratch_shapes=[
            pltpu.VMEM((C, S), jnp.float32),                      # activation
            pltpu.VMEM((9 * C, S), jnp.float32),                  # im2col slab
        ],
        compiler_params=pltpu.CompilerParams(
            dimension_semantics=("parallel", "arbitrary"),
            vmem_limit_bytes=32 * 1024 * 1024),
    )(x, w, masks)

    return out.reshape(N, C, H, W)


# ----------------------------- Reference (JAX) ------------------------------- #

def residual_group_reference(x_nchw, weights_oihw, operand_dtype=None):
    res = x_nchw
    for w in weights_oihw:
        lhs = res if operand_dtype is None else res.astype(operand_dtype)
        rhs = w if operand_dtype is None else w.astype(operand_dtype)
        res = lax.conv_general_dilated(
            lhs, rhs, window_strides=(1, 1), padding=((1, 1), (1, 1)),
            dimension_numbers=("NCHW", "OIHW", "NCHW"),
            preferred_element_type=jnp.float32)
    return jnp.maximum(res + x_nchw, 0.0)


# ----------------------------------- Main ------------------------------------ #

if __name__ == "__main__":
    # Module-consistent small config: n_feat=8, kernel_size=3, n_resblocks=2.
    N, C, H, W = 2, 8, 16, 16
    n_resblocks = 2

    key = jax.random.PRNGKey(0)
    key, xkey = jax.random.split(key)
    x = jax.random.normal(xkey, (N, C, H, W), dtype=jnp.float32)

    weights = []
    for _ in range(n_resblocks):
        key, wkey = jax.random.split(key)
        weights.append(0.1 * jax.random.normal(wkey, (C, C, 3, 3), dtype=jnp.float32))

    out = jax.block_until_ready(residual_group_forward(x, weights))
    assert out.shape == (N, C, H, W)

    # Reference with bf16 conv operands (same numerics as the kernel's MXU path).
    ref_bf16 = jax.block_until_ready(
        residual_group_reference(x, weights, operand_dtype=jnp.bfloat16))
    assert jnp.allclose(out, ref_bf16, atol=2e-3, rtol=2e-3), (
        f"max abs err vs bf16 ref: {jnp.max(jnp.abs(out - ref_bf16))}")

    # Full-f32 reference sanity check (looser: bf16 MXU operands by design).
    ref_f32 = jax.block_until_ready(residual_group_reference(x, weights))
    assert jnp.allclose(out, ref_f32, atol=5e-2, rtol=5e-2), (
        f"max abs err vs f32 ref: {jnp.max(jnp.abs(out - ref_f32))}")

    print("KERNEL_OK")
</pallas_src>

<mosaic_0001>
module attributes {stable_mosaic.version = 11 : i64} {
  func.func @_residual_group_kernel(%arg0: i32, %arg1: i32, %arg2: memref<1x8x256xf32, #tpu.memory_space<vmem>>, %arg3: memref<1x8x72xbf16, #tpu.memory_space<vmem>>, %arg4: memref<9x1x256xf32, #tpu.memory_space<vmem>>, %arg5: memref<1x8x256xf32, #tpu.memory_space<vmem>>, %arg6: memref<8x256xf32, #tpu.memory_space<vmem>>, %arg7: memref<72x256xf32, #tpu.memory_space<vmem>>) attributes {dimension_semantics = [#tpu.dimension_semantics<parallel>, #tpu.dimension_semantics<arbitrary>], iteration_bounds = array<i64: 2, 2>, scalar_prefetch = 0 : i64, scratch_operands = 2 : i64, tpu.core_type = #tpu.core_type<tc>, window_params = [{transform_indices = @transform_0, window_bounds = array<i64: 1, 8, 256>}, {transform_indices = @transform_1, window_bounds = array<i64: 1, 8, 72>}, {pipeline_mode = #tpu.pipeline_mode<synchronous>, transform_indices = @transform_2, window_bounds = array<i64: 9, 1, 256>}, {transform_indices = @transform_3, window_bounds = array<i64: 1, 8, 256>}]} {
    %c0_i32 = arith.constant 0 : i32
    %0 = arith.cmpi eq, %arg1, %c0_i32 : i32
    %1 = arith.extui %0 : i1 to i32
    %c0_i32_0 = arith.constant 0 : i32
    %2 = arith.cmpi ne, %1, %c0_i32_0 : i32
    scf.if %2 {
      %c0_39 = arith.constant 0 : index
      %c0_40 = arith.constant 0 : index
      %c0_41 = arith.constant 0 : index
      %64 = vector.load %arg2[%c0_39, %c0_40, %c0_41] : memref<1x8x256xf32, #tpu.memory_space<vmem>>, vector<1x8x256xf32>
      %65 = vector.shape_cast %64 : vector<1x8x256xf32> to vector<8x256xf32>
      %c0_42 = arith.constant 0 : index
      %c0_43 = arith.constant 0 : index
      %66 = vector.load %arg6[%c0_42, %c0_43] : memref<8x256xf32, #tpu.memory_space<vmem>>, vector<8x256xf32>
      tpu.vector_store %arg6[%c0_42, %c0_43], %65 {strides = array<i32>} : memref<8x256xf32, #tpu.memory_space<vmem>>, vector<8x256xf32>,
    } else {
    }
    %c0 = arith.constant 0 : index
    %c0_1 = arith.constant 0 : index
    %3 = vector.load %arg6[%c0, %c0_1] : memref<8x256xf32, #tpu.memory_space<vmem>>, vector<8x256xf32>
    %c17_i32 = arith.constant 17 : i32
    %4 = tpu.dynamic_rotate %3 by %c17_i32 dim 1 : vector<8x256xf32>, i32 -> vector<8x256xf32>
    %c0_2 = arith.constant 0 : index
    %c0_3 = arith.constant 0 : index
    %c0_4 = arith.constant 0 : index
    %5 = vector.load %arg4[%c0_2, %c0_3, %c0_4] : memref<9x1x256xf32, #tpu.memory_space<vmem>>, vector<1x1x256xf32>
    %6 = vector.shape_cast %5 : vector<1x1x256xf32> to vector<1x256xf32>
    %7 = vector.broadcast %6 : vector<1x256xf32> to vector<8x256xf32>
    %8 = arith.mulf %4, %7 : vector<8x256xf32>
    %c0_5 = arith.constant 0 : index
    %c0_6 = arith.constant 0 : index
    %9 = vector.load %arg7[%c0_5, %c0_6] : memref<72x256xf32, #tpu.memory_space<vmem>>, vector<8x256xf32>
    tpu.vector_store %arg7[%c0_5, %c0_6], %8 {strides = array<i32>} : memref<72x256xf32, #tpu.memory_space<vmem>>, vector<8x256xf32>,
    %c16_i32 = arith.constant 16 : i32
    %10 = tpu.dynamic_rotate %3 by %c16_i32 dim 1 : vector<8x256xf32>, i32 -> vector<8x256xf32>
    %c1 = arith.constant 1 : index
    %c0_7 = arith.constant 0 : index
    %c0_8 = arith.constant 0 : index
    %11 = vector.load %arg4[%c1, %c0_7, %c0_8] : memref<9x1x256xf32, #tpu.memory_space<vmem>>, vector<1x1x256xf32>
    %12 = vector.shape_cast %11 : vector<1x1x256xf32> to vector<1x256xf32>
    %13 = vector.broadcast %12 : vector<1x256xf32> to vector<8x256xf32>
    %14 = arith.mulf %10, %13 : vector<8x256xf32>
    %c8 = arith.constant 8 : index
    %c0_9 = arith.constant 0 : index
    %15 = vector.load %arg7[%c8, %c0_9] : memref<72x256xf32, #tpu.memory_space<vmem>>, vector<8x256xf32>
    tpu.vector_store %arg7[%c8, %c0_9], %14 {strides = array<i32>} : memref<72x256xf32, #tpu.memory_space<vmem>>, vector<8x256xf32>,
    %c15_i32 = arith.constant 15 : i32
    %16 = tpu.dynamic_rotate %3 by %c15_i32 dim 1 : vector<8x256xf32>, i32 -> vector<8x256xf32>
    %c2 = arith.constant 2 : index
    %c0_10 = arith.constant 0 : index
    %c0_11 = arith.constant 0 : index
    %17 = vector.load %arg4[%c2, %c0_10, %c0_11] : memref<9x1x256xf32, #tpu.memory_space<vmem>>, vector<1x1x256xf32>
    %18 = vector.shape_cast %17 : vector<1x1x256xf32> to vector<1x256xf32>
    %19 = vector.broadcast %18 : vector<1x256xf32> to vector<8x256xf32>
    %20 = arith.mulf %16, %19 : vector<8x256xf32>
    %c16 = arith.constant 16 : index
    %c0_12 = arith.constant 0 : index
    %21 = vector.load %arg7[%c16, %c0_12] : memref<72x256xf32, #tpu.memory_space<vmem>>, vector<8x256xf32>
    tpu.vector_store %arg7[%c16, %c0_12], %20 {strides = array<i32>} : memref<72x256xf32, #tpu.memory_space<vmem>>, vector<8x256xf32>,
    %c1_i32 = arith.constant 1 : i32
    %22 = tpu.dynamic_rotate %3 by %c1_i32 dim 1 : vector<8x256xf32>, i32 -> vector<8x256xf32>
    %c3 = arith.constant 3 : index
    %c0_13 = arith.constant 0 : index
    %c0_14 = arith.constant 0 : index
    %23 = vector.load %arg4[%c3, %c0_13, %c0_14] : memref<9x1x256xf32, #tpu.memory_space<vmem>>, vector<1x1x256xf32>
    %24 = vector.shape_cast %23 : vector<1x1x256xf32> to vector<1x256xf32>
    %25 = vector.broadcast %24 : vector<1x256xf32> to vector<8x256xf32>
    %26 = arith.mulf %22, %25 : vector<8x256xf32>
    %c24 = arith.constant 24 : index
    %c0_15 = arith.constant 0 : index
    %27 = vector.load %arg7[%c24, %c0_15] : memref<72x256xf32, #tpu.memory_space<vmem>>, vector<8x256xf32>
    tpu.vector_store %arg7[%c24, %c0_15], %26 {strides = array<i32>} : memref<72x256xf32, #tpu.memory_space<vmem>>, vector<8x256xf32>,
    %c32 = arith.constant 32 : index
    %c0_16 = arith.constant 0 : index
    %28 = vector.load %arg7[%c32, %c0_16] : memref<72x256xf32, #tpu.memory_space<vmem>>, vector<8x256xf32>
    tpu.vector_store %arg7[%c32, %c0_16], %3 {strides = array<i32>} : memref<72x256xf32, #tpu.memory_space<vmem>>, vector<8x256xf32>,
    %c255_i32 = arith.constant 255 : i32
    %29 = tpu.dynamic_rotate %3 by %c255_i32 dim 1 : vector<8x256xf32>, i32 -> vector<8x256xf32>
    %c5 = arith.constant 5 : index
    %c0_17 = arith.constant 0 : index
    %c0_18 = arith.constant 0 : index
    %30 = vector.load %arg4[%c5, %c0_17, %c0_18] : memref<9x1x256xf32, #tpu.memory_space<vmem>>, vector<1x1x256xf32>
    %31 = vector.shape_cast %30 : vector<1x1x256xf32> to vector<1x256xf32>
    %32 = vector.broadcast %31 : vector<1x256xf32> to vector<8x256xf32>
    %33 = arith.mulf %29, %32 : vector<8x256xf32>
    %c40 = arith.constant 40 : index
    %c0_19 = arith.constant 0 : index
    %34 = vector.load %arg7[%c40, %c0_19] : memref<72x256xf32, #tpu.memory_space<vmem>>, vector<8x256xf32>
    tpu.vector_store %arg7[%c40, %c0_19], %33 {strides = array<i32>} : memref<72x256xf32, #tpu.memory_space<vmem>>, vector<8x256xf32>,
    %c241_i32 = arith.constant 241 : i32
    %35 = tpu.dynamic_rotate %3 by %c241_i32 dim 1 : vector<8x256xf32>, i32 -> vector<8x256xf32>
    %c6 = arith.constant 6 : index
    %c0_20 = arith.constant 0 : index
    %c0_21 = arith.constant 0 : index
    %36 = vector.load %arg4[%c6, %c0_20, %c0_21] : memref<9x1x256xf32, #tpu.memory_space<vmem>>, vector<1x1x256xf32>
    %37 = vector.shape_cast %36 : vector<1x1x256xf32> to vector<1x256xf32>
    %38 = vector.broadcast %37 : vector<1x256xf32> to vector<8x256xf32>
    %39 = arith.mulf %35, %38 : vector<8x256xf32>
    %c48 = arith.constant 48 : index
    %c0_22 = arith.constant 0 : index
    %40 = vector.load %arg7[%c48, %c0_22] : memref<72x256xf32, #tpu.memory_space<vmem>>, vector<8x256xf32>
    tpu.vector_store %arg7[%c48, %c0_22], %39 {strides = array<i32>} : memref<72x256xf32, #tpu.memory_space<vmem>>, vector<8x256xf32>,
    %c240_i32 = arith.constant 240 : i32
    %41 = tpu.dynamic_rotate %3 by %c240_i32 dim 1 : vector<8x256xf32>, i32 -> vector<8x256xf32>
    %c7 = arith.constant 7 : index
    %c0_23 = arith.constant 0 : index
    %c0_24 = arith.constant 0 : index
    %42 = vector.load %arg4[%c7, %c0_23, %c0_24] : memref<9x1x256xf32, #tpu.memory_space<vmem>>, vector<1x1x256xf32>
    %43 = vector.shape_cast %42 : vector<1x1x256xf32> to vector<1x256xf32>
    %44 = vector.broadcast %43 : vector<1x256xf32> to vector<8x256xf32>
    %45 = arith.mulf %41, %44 : vector<8x256xf32>
    %c56 = arith.constant 56 : index
    %c0_25 = arith.constant 0 : index
    %46 = vector.load %arg7[%c56, %c0_25] : memref<72x256xf32, #tpu.memory_space<vmem>>, vector<8x256xf32>
    tpu.vector_store %arg7[%c56, %c0_25], %45 {strides = array<i32>} : memref<72x256xf32, #tpu.memory_space<vmem>>, vector<8x256xf32>,
    %c239_i32 = arith.constant 239 : i32
    %47 = tpu.dynamic_rotate %3 by %c239_i32 dim 1 : vector<8x256xf32>, i32 -> vector<8x256xf32>
    %c8_26 = arith.constant 8 : index
    %c0_27 = arith.constant 0 : index
    %c0_28 = arith.constant 0 : index
    %48 = vector.load %arg4[%c8_26, %c0_27, %c0_28] : memref<9x1x256xf32, #tpu.memory_space<vmem>>, vector<1x1x256xf32>
    %49 = vector.shape_cast %48 : vector<1x1x256xf32> to vector<1x256xf32>
    %50 = vector.broadcast %49 : vector<1x256xf32> to vector<8x256xf32>
    %51 = arith.mulf %47, %50 : vector<8x256xf32>
    %c64 = arith.constant 64 : index
    %c0_29 = arith.constant 0 : index
    %52 = vector.load %arg7[%c64, %c0_29] : memref<72x256xf32, #tpu.memory_space<vmem>>, vector<8x256xf32>
    tpu.vector_store %arg7[%c64, %c0_29], %51 {strides = array<i32>} : memref<72x256xf32, #tpu.memory_space<vmem>>, vector<8x256xf32>,
    %c0_30 = arith.constant 0 : index
    %c0_31 = arith.constant 0 : index
    %c0_32 = arith.constant 0 : index
    %53 = vector.load %arg3[%c0_30, %c0_31, %c0_32] : memref<1x8x72xbf16, #tpu.memory_space<vmem>>, vector<1x8x72xbf16>
    %54 = vector.shape_cast %53 : vector<1x8x72xbf16> to vector<8x72xbf16>
    %c0_33 = arith.constant 0 : index
    %c0_34 = arith.constant 0 : index
    %55 = vector.load %arg7[%c0_33, %c0_34] : memref<72x256xf32, #tpu.memory_space<vmem>>, vector<72x256xf32>
    %56 = arith.truncf %55 : vector<72x256xf32> to vector<72x256xbf16>
    %cst = arith.constant dense<0.000000e+00> : vector<8x256xf32>
    %57 = tpu.matmul %54, %56, %cst {dimension_numbers = #tpu.dot_dimension_numbers<[1], [0], [0], [1], [0, 0, 1, 1], [], []>} : vector<8x72xbf16>, vector<72x256xbf16>, vector<8x256xf32> -> vector<8x256xf32>
    %c1_i32_35 = arith.constant 1 : i32
    %58 = arith.cmpi slt, %arg1, %c1_i32_35 : i32
    %59 = arith.extui %58 : i1 to i32
    %c0_i32_36 = arith.constant 0 : i32
    %60 = arith.cmpi ne, %59, %c0_i32_36 : i32
    scf.if %60 {
      %c0_39 = arith.constant 0 : index
      %c0_40 = arith.constant 0 : index
      %64 = vector.load %arg6[%c0_39, %c0_40] : memref<8x256xf32, #tpu.memory_space<vmem>>, vector<8x256xf32>
      tpu.vector_store %arg6[%c0_39, %c0_40], %57 {strides = array<i32>} : memref<8x256xf32, #tpu.memory_space<vmem>>, vector<8x256xf32>,
    } else {
    }
    %c1_i32_37 = arith.constant 1 : i32
    %61 = arith.cmpi eq, %arg1, %c1_i32_37 : i32
    %62 = arith.extui %61 : i1 to i32
    %c0_i32_38 = arith.constant 0 : i32
    %63 = arith.cmpi ne, %62, %c0_i32_38 : i32
    scf.if %63 {
      %c0_39 = arith.constant 0 : index
      %c0_40 = arith.constant 0 : index
      %c0_41 = arith.constant 0 : index
      %64 = vector.load %arg2[%c0_39, %c0_40, %c0_41] : memref<1x8x256xf32, #tpu.memory_space<vmem>>, vector<1x8x256xf32>
      %65 = vector.shape_cast %64 : vector<1x8x256xf32> to vector<8x256xf32>
      %66 = arith.addf %57, %65 : vector<8x256xf32>
      %cst_42 = arith.constant 0.000000e+00 : f32
      %67 = vector.broadcast %cst_42 : f32 to vector<8x256xf32>
      %68 = arith.maximumf %66, %67 : vector<8x256xf32>
      %c0_43 = arith.constant 0 : index
      %c0_44 = arith.constant 0 : index
      %c0_45 = arith.constant 0 : index
      %69 = vector.load %arg5[%c0_43, %c0_44, %c0_45] : memref<1x8x256xf32, #tpu.memory_space<vmem>>, vector<1x8x256xf32>
      %70 = vector.shape_cast %69 : vector<1x8x256xf32> to vector<8x256xf32>
      %71 = vector.shape_cast %68 : vector<8x256xf32> to vector<1x8x256xf32>
      tpu.vector_store %arg5[%c0_43, %c0_44, %c0_45], %71 {strides = array<i32>} : memref<1x8x256xf32, #tpu.memory_space<vmem>>, vector<1x8x256xf32>,
    } else {
    }
    return
  }
  func.func @transform_0(%arg0: i32, %arg1: i32) -> (i32, i32, i32) {
    %c0_i32 = arith.constant 0 : i32
    %c0_i32_0 = arith.constant 0 : i32
    %c0_i32_1 = arith.constant 0 : i32
    return %arg0, %c0_i32, %c0_i32_0 : i32, i32, i32
  }
  func.func @transform_1(%arg0: i32, %arg1: i32) -> (i32, i32, i32) {
    %c0_i32 = arith.constant 0 : i32
    %c0_i32_0 = arith.constant 0 : i32
    %c0_i32_1 = arith.constant 0 : i32
    return %arg1, %c0_i32, %c0_i32_0 : i32, i32, i32
  }
  func.func @transform_2(%arg0: i32, %arg1: i32) -> (i32, i32, i32) {
    %c0_i32 = arith.constant 0 : i32
    %c0_i32_0 = arith.constant 0 : i32
    %c0_i32_1 = arith.constant 0 : i32
    %c0_i32_2 = arith.constant 0 : i32
    return %c0_i32, %c0_i32_0, %c0_i32_1 : i32, i32, i32
  }
  func.func @transform_3(%arg0: i32, %arg1: i32) -> (i32, i32, i32) {
    %c0_i32 = arith.constant 0 : i32
    %c0_i32_0 = arith.constant 0 : i32
    %c0_i32_1 = arith.constant 0 : i32
    return %arg0, %c0_i32, %c0_i32_0 : i32, i32, i32
  }
}

</mosaic_0001>

<bundles_post_ra>
// kernel: tpu_custom_call.1
= control target key start
LH: loop header
LB: loop body
LE: loop exit
PB: predicated region body
PF: predicated region fallthrough
CT: control target
= control target key end

     0   :  { %s1408_s0 = inlined_call_operand.hbm [shape: f32[2,8,256], index: 0, kind: input, shape index: {}]   ;;  %s1409_s1 = inlined_call_operand.hbm [shape: bf16[2,8,72], index: 1, kind: input, shape index: {}]   ;;  %s1410_s2 = inlined_call_operand.hbm [shape: f32[9,1,256], index: 2, kind: input, shape index: {}]   ;;  %s1411_s3 = inlined_call_operand.hbm [shape: f32[2,8,256], index: 3, kind: output, shape index: {}]  }
   0x1   :  { %1419 = sst [smem:[#allocation18_spill]] %s1408_s0 }
   0x2   :  { %1420 = sst [smem:[#allocation19_spill]] %s1410_s2 }
   0x3   :  { %1421 = sst [smem:[#allocation20_spill]] %s1411_s3 }
   0x4   :  { %8 = vsyncpa [#allocation5], 0 }
   0x5   :  { %10 = vsyncpa [#allocation5 + $0x1], 0 }
   0x6   :  { %11 = vsyncpa [#allocation8], 0 }
   0x7   :  { %13 = vsyncpa [#allocation8 + $0x1], 0 }
   0x8   :  { %14 = vsyncpa [#allocation6], 0 }
   0x9   :  { %16 = vsyncpa [#allocation6 + $0x1], 0  ;;  %s1086_s12 = smov 0   ;;  %s1088_s13 = smov 0  }
   0xa   :  { %s1090_s14 = smov 0   ;;  %s1092_s15 = smov 0  }
   0xb   :  { %s1094_s16 = smov 0   ;;  %s1096_s17 = smov 0  }
   0xc   :  { %s1098_s18 = smov 0   ;;  %s1100_s19 = smov 0  }
   0xd   :  { %s1102_s20 = smov 0   ;;  %s1104_s21 = smov 0  }
   0xe   :  { %s1106_s22 = smov 0  }
   0xf LB: > { %1422 = sst [smem:[#allocation15_spill]] %s1021_s15  ;;  %s1142_s23 = sadd.s32 4294967295, %s1049_s22   ;;  %s1049_s22 = sphi %s1106_s22, %s22_s22   ;;  %s1045_s21 = sphi %s1104_s21, %s1456_s21   ;;  %s1041_s20 = sphi %s1102_s20, %s1455_s20   ;;  %s1037_s19 = sphi %s1100_s19, %s1454_s19   ;;  %s1033_s18 = sphi %s1098_s18, %s1453_s18   ;;  %s1029_s17 = sphi %s1096_s17, %s1452_s17   ;;  %s1025_s16 = sphi %s1094_s16, %s1451_s16   ;;  %s1021_s15 = sphi %s1092_s15, %s1450_s15   ;;  %s1017_s14 = sphi %s1090_s14, %s1449_s14   ;;  %s1013_s13 = sphi %s1088_s13, %s1448_s13   ;;  %s1009_s12 = sphi %s1086_s12, %s1447_s12  }
  0x10   : > { %p685_p0 = scmp.ge.s32.totalorder %s1049_s22, 1  ;;  %p1413_p1 = scmp.eq.s32.totalorder %s1142_s23, 0 }
  0x11   : > { %p138_p2 = scmp.lt.s32.totalorder %s1049_s22, 5  ;;  %s1051_s25 = smov [#allocation9]  }
  0x12   : > { %s150_s26 = sshll.u32 %s1051_s25, 4  ;;  %s151_s26 = int_to_ptr.vmem [resolvable:$true] %s150_s26 }
  0x13   : > { %p1147_p3 = pnand %p685_p0, %p138_p2  ;;  %s850_s27 = scalar_lea.vmem %s151_s26, 288 }
  0x14   : > { %p851_p7 = scmp.ne.s32.totalorder %s151_s26, %s850_s27  ;;  %p858_p10 = scmp.lt.s32.totalorder %s151_s26, %s151_s26 }
  0x15   : > { %p720_p4 = pneg %p1147_p3  ;;  %p859_p11 = scmp.lt.s32.totalorder %s850_s27, %s850_s27 }
  0x17   : > { %p721_p5 = pnand %p720_p4, %p1413_p1  ;;  %p860_p12 = por %p859_p11, %p858_p10 }
  0x19   : > { %p841_p6 = pneg %p721_p5 }
  0x1b   : > { %p853_p8 = pnand %p851_p7, %p841_p6 }
  0x1d   : > { %p854_p9 = pneg %p853_p8 }
  0x1f   : > { %p861_p13 = pnand %p860_p12, %p854_p9 }
  0x21   : > { %864 = shalt.err (!%p861_p13)
}
  0x22   : > { %s1052_s28 = smov 32   ;;  %s1053_s29 = smov 2  }
  0x23   : > { %s1424_s2 = sld [smem:[#allocation19_spill]]  ;;  %s684_s5 = sadd.s32 4294967294, %s1049_s22  }
  0x24   : > { %p48_p0 = scmp.ne.s32.totalorder %s1029_s17, %s1025_s16  ;;  %p1414_p2 = scmp.eq.s32.totalorder %s1049_s22, 0 }
  0x25   : > { %p54_p4 = scmp.ne.s32.totalorder %s1025_s16, %s1021_s15  ;;  %p125_p6 = scmp.eq.s32.totalorder %s1142_s23, 3 }
  0x26   : > { %p50_p7 = por %p1414_p2, %p48_p0  ;;  %p131_p8 = scmp.eq.s32.totalorder %s684_s5, 3 }
  0x27   : > { %p1171_p9 = por %p1413_p1, %p54_p4  ;;  %p1175_p10 = por %p125_p6, %p48_p0 }
  0x28   : > { %p736_p11 = scmp.lt.s32.totalorder %s1049_s22, 4  ;;  %s164_s11 = sand.u32 1, %s1029_s17  }
  0x29   : > { %723 = dma.hbm_to_vmem [thread:$0]  (!%p721_p5), %s1424_s2, 288, %s151_s26, [#allocation8], %s1052_s28, %s1052_s28, %s1053_s29  }
  0x2a   : > { %s1426_s9 = scalar_select %p1175_p10, 1, 0 }
  0x2b   : > { %p1179_p5 = por %p131_p8, %p54_p4  ;;  %s708_s25 = sshll.u32 %s1045_s21, 8 }
  0x2c   : > { %s688_s26 = sshll.u32 %s164_s11, 4  ;;  %s1429_s0 = sld [smem:[#allocation18_spill]] }
  0x2d   : > { %s1427_s10 = scalar_select %p1179_p5, 1, 0 }
  0x2e   : > { %s168_s30 = scalar_lea.vmem [#allocation4], %s688_s26  ;;  %p1191_p12 = pnand %p736_p11, %p50_p7 }
  0x2f   : > { %1428 = sst [smem:[#allocation16_spill]] %s1427_s10  ;;  %s176_s4 = sshll.u32 %s168_s30, 4  ;;  %s177_s4 = int_to_ptr.vmem [resolvable:$true] %s176_s4 }
  0x30   : > { %s165_s7 = scalar_lea.sflag [#allocation5], %s164_s11  ;;  %p867_p13 = pneg %p1191_p12 }
  0x31   : > { %s878_s6 = scalar_lea.vmem %s177_s4, 256  ;;  %s1054_s2 = smov [#allocation4]  }
  0x32   : > { %s174_s29 = scalar_lea.hbm %s1429_s0, %s708_s25  ;;  %p879_p0 = scmp.ne.s32.totalorder %s177_s4, %s878_s6 }
  0x33   : > { %s883_s10 = sshll.u32 %s1054_s2, 4  ;;  %s884_s10 = int_to_ptr.vmem [resolvable:$false] %s883_s10 }
  0x34   : > { %p881_p4 = pnand %p879_p0, %p867_p13  ;;  %s885_s25 = scalar_lea.vmem %s884_s10, 512 }
  0x35   : > { %p886_p8 = scmp.lt.s32.totalorder %s177_s4, %s884_s10  ;;  %p887_p1 = scmp.lt.s32.totalorder %s885_s25, %s878_s6 }
  0x36   : > { %p882_p6 = pneg %p881_p4 }
  0x37   : > { %p888_p2 = por %p887_p1, %p886_p8 }
  0x39   : > { %p889_p7 = pnand %p888_p2, %p882_p6 }
  0x3b   : > { %892 = shalt.err (!%p889_p7)
}
  0x3c   : > { %727 = dma.hbm_to_vmem [thread:$0]  (!%p1191_p12), %s174_s29, 256, %s177_s4, %s165_s7  }
  0x3d   : > { %s31_s2 = sadd.s32 1, %s1041_s20  ;;  %s67_s6 = sadd.s32 1, %s1017_s14 }
  0x3e   : > { %p32_p1 = scmp.ge.s32.totalorder %s31_s2, 2  ;;  %p74_p2 = scmp.ne.s32.totalorder %s1017_s14, %s1013_s13 }
  0x3f   : > { %p80_p13 = scmp.ne.s32.totalorder %s1013_s13, %s1009_s12  ;;  %s183_s10 = sand.u32 1, %s1049_s22  }
  0x40   : > { %s1458_s2 = smov (%p32_p1, %s31_s2), 0  ;;  %s1432_s11 = sadd.s32 1, %s1045_s21 }
  0x41   : > { %1431 = sst [smem:[#allocation17_spill]] %s1458_s2  ;;  %s1460_s11 = smov (!%p32_p1, %s1432_s11), %s1045_s21 }
  0x42   : > { %s64_s26 = ssub.s32 %s1041_s20, %s1458_s2  ;;  %p1433_p0 = scmp.eq.s32.totalorder %s1049_s22, 0 }
  0x43   : > { %p36_p12 = scmp.ge.s32.totalorder %s1460_s11, 2  ;;  %p65_p6 = scmp.eq.s32.totalorder %s64_s26, 0 }
  0x44   : > { %p1215_p4 = por %p74_p2, %p1433_p0  ;;  %p1435_p8 = scmp.eq.s32.totalorder %s1142_s23, 0 }
  0x45   : > { %s1462_s11 = smov (%p36_p12, %s1460_s11), 0  ;;  %s185_s29 = sand.u32 1, %s1017_s14  }
  0x46   : > { %p1221_p7 = por %p80_p13, %p1435_p8  ;;  %s38_s28 = ssub.s32 %s1045_s21, %s1462_s11 }
  0x47   : > { %s1228_s27 = scalar_select %p65_p6, %s1017_s14, %s67_s6  }
  0x48   : > { %p39_p1 = scmp.eq.s32.totalorder %s38_s28, 0  ;;  %s691_s30 = sshll.u32 %s185_s29, 2 }
  0x49   : > { %s692_s4 = sshll.u32 %s1041_s20, 6  ;;  %s1437_s5 = sadd.s32 1, %s1029_s17 }
  0x4a   : > { %s1237_s25 = scalar_select %p39_p1, %s1029_s17, %s1437_s5  }
  0x4b   : > { %s192_s2 = scalar_lea.hbm %s1409_s1, %s692_s4  ;;  %s187_s15 = scalar_lea.vmem [#allocation7], %s691_s30 }
  0x4c   : > { %s194_s3 = sshll.u32 %s187_s15, 4  ;;  %p1246_p2 = pnand %p736_p11, %p1215_p4  ;;  %s195_s3 = int_to_ptr.vmem [resolvable:$true] %s194_s3 }
  0x4d   : > { %s184_s28 = scalar_lea.sflag [#allocation8], %s183_s10  ;;  %s906_s29 = scalar_lea.vmem %s195_s3, 64 }
  0x4e   : > { %p895_p13 = pneg %p1246_p2  ;;  %p907_p0 = scmp.ne.s32.totalorder %s195_s3, %s906_s29 }
  0x4f   : > { %s1055_s5 = smov [#allocation7]  }
  0x50   : > { %p909_p12 = pnand %p907_p0, %p895_p13  ;;  %s911_s0 = sshll.u32 %s1055_s5, 4  ;;  %s912_s0 = int_to_ptr.vmem [resolvable:$false] %s911_s0 }
  0x51   : > { %s913_s30 = scalar_lea.vmem %s912_s0, 128  ;;  %p914_p8 = scmp.lt.s32.totalorder %s195_s3, %s912_s0 }
  0x52   : > { %p910_p6 = pneg %p909_p12  ;;  %p915_p1 = scmp.lt.s32.totalorder %s913_s30, %s906_s29 }
  0x54   : > { %p916_p5 = por %p915_p1, %p914_p8 }
  0x56   : > { %p917_p10 = pnand %p916_p5, %p910_p6 }
  0x58   : > { %920 = shalt.err (!%p917_p10)
}
  0x59   : > { %730 = dma.hbm_to_vmem [thread:$0]  (!%p1246_p2), %s192_s2, 64, %s195_s3, %s184_s28  }
  0x5a   : > { %203 = sbr.rel (%p1147_p3) target bundleno = 509 (0x1fd), region = 32  ;;  %s1257_s15 = sand.u32 (!%p1147_p3), 1, %s1025_s16  }
  0x5b   : > { %s694_s10 = sshll.u32 (!%p1147_p3), %s1257_s15, 4  ;;  %s206_s7 = scalar_lea.sflag (!%p1147_p3), [#allocation5], %s1257_s15 }
  0x5c   : > { %s1261_s4 = scalar_lea.vmem (!%p1147_p3), [#allocation4], %s694_s10 }
  0x5f   : > { %992 = dma.done.wait (%p1171_p9), %s206_s7, 256  }
  0x60   : > { %994 = vsyncadd (%p1171_p9), %s206_s7, 4294967040  ;;  %s214_s3 = sand.u32 1, %s1142_s23   ;;  %s216_s24 = sand.u32 1, %s1013_s13  }
  0x61   : > { %s1269_s2 = sshll.u32 %s216_s24, 2  ;;  %s215_s26 = scalar_lea.sflag [#allocation8], %s214_s3 }
  0x62   : > { %s218_s6 = scalar_lea.vmem [#allocation7], %s1269_s2 }
  0x63   : > { %996 = dma.done.wait (%p1221_p7), %s215_s26, 64  }
  0x64   : > { %998 = vsyncadd (%p1221_p7), %s215_s26, 4294967232  ;;  %p1439_p3 = scmp.eq.s32.totalorder %s1142_s23, 0 }
  0x66   : > { %1000 = dma.done.wait (%p1439_p3), [#allocation8], 288   ;;  %p1440_p9 = pmov %p1439_p3 }
  0x67   : > { %s1280_s8 = scalar_lea.vmem [#allocation10], %s694_s10  ;;  %p698_p10 = scmp.ne.s32.totalorder %s1033_s18, 0 }
  0x68   : > { %1002 = vsyncadd (%p1440_p9), [#allocation8], 4294967008 }
  0x69   : > { %254 = sbr.rel (%p698_p10) target bundleno = 112 (0x70), region = 48 }
  0x6e   : > { %v255_v0 = vld [vmem:[%s1261_s4] sm:$0xff]  ;;  %v256_v1 = vld [vmem:[%s1261_s4 + $0x8] sm:$0xff] }
  0x6f   : > { %257 = vst [vmem:[#allocation2] sm:$0xff] %v255_v0  ;;  %258 = vst [vmem:[#allocation2 + $0x8] sm:$0xff] %v256_v1 }
  0x70 PF: > { %s1056_s12 = smov 113   ;;  %s1057_s28 = smov 111   ;;  %v1062_v4 = vmov 0   ;;  %v265_v5 = vlaneseq  ;;  %v440_v10 = vld [vmem:[#allocation9 + $0x10] sm:$0x3]  ;;  %vm489_vm3 = vcmask 1043456  }
  0x71   : > { %s1058_s23 = smov 112   ;;  %s1059_s29 = smov 127   ;;  %528 = vmatprep.mubr.bf16.mxu0 %v1062_v4  ;;  %v392_v13 = vld [vmem:[#allocation9 + $0xc] sm:$0x3]  ;;  %v416_v15 = vld [vmem:[#allocation9 + $0xe] sm:$0x3] }
  0x72   : > { %s1060_s5 = smov 15   ;;  %s1061_s0 = smov 1   ;;  %v273_v6 = vshrl.u32 %v265_v5, 7  ;;  %v1305_v7 = vand.u32 127, %v265_v5  ;;  %v368_v24 = vld [vmem:[#allocation9 + $0xa] sm:$0x3] }
  0x73   : > { %s1063_s30 = smov 17   ;;  %s1064_s10 = smov 16   ;;  %v318_v51 = vld [vmem:[#allocation9 + $0x4] sm:$0x3]  ;;  %v342_v52 = vld [vmem:[#allocation9 + $0x6] sm:$0x3] }
  0x74   : > { %v1307_v8 = vsub.s32 0, %v273_v6  ;;  %v1309_v9 = vsub.s32 1, %v273_v6  ;;  %vm436_vm0 = vcmp.lt.s32.totalorder %v1305_v7, 111  ;;  %vm388_vm1 = vcmp.lt.s32.totalorder %v1305_v7, 113  ;;  %p701_p5 = scmp.ge.s32.totalorder %s1033_s18, 1 }
  0x75   : > { %vm412_vm2 = vcmp.lt.s32.totalorder %v1305_v7, 112  ;;  %vm364_vm4 = vcmp.lt.s32.totalorder %v1305_v7, 127  ;;  %vm314_vm5 = vcmp.lt.s32.totalorder %v1305_v7, 15  ;;  %vm338_vm6 = vcmp.lt.s32.totalorder %v1305_v7, 1 }
  0x76   : > { %v1285_v2 = vld [vmem:[#allocation2] sm:$0xff]  ;;  %v1289_v3 = vld [vmem:[#allocation2 + $0x8] sm:$0xff]  ;;  %v445_v14 = vrot.slane %v440_v10, %v1307_v8  ;;  %v449_v16 = vrot.slane %v440_v10, %v1309_v9  ;;  %v397_v17 = vrot.slane %v392_v13, %v1307_v8  ;;  %v401_v20 = vrot.slane %v392_v13, %v1309_v9  ;;  %v270_v10 = vld [vmem:[#allocation9] sm:$0x3] }
  0x77   : > { %384 = vrot.lane.b32.xlu1 %v1285_v2, %s1056_s12  ;;  %432 = vrot.lane.b32.xlu0 %v1285_v2, %s1057_s28  ;;  %v421_v23 = vrot.slane %v416_v15, %v1307_v8  ;;  %v425_v27 = vrot.slane %v416_v15, %v1309_v9  ;;  %v373_v34 = vrot.slane %v368_v24, %v1307_v8  ;;  %vm267_vm7 = vcmp.lt.s32.totalorder %v1305_v7, 17 }
  0x78   : > { %v377_v38 = vrot.slane %v368_v24, %v1309_v9  ;;  %v323_v57 = vrot.slane %v318_v51, %v1307_v8  ;;  %v327_v58 = vrot.slane %v318_v51, %v1309_v9  ;;  %v347_v59 = vrot.slane %v342_v52, %v1307_v8 }
  0x79   : > { %v351_v60 = vrot.slane %v342_v52, %v1309_v9  ;;  %vm290_vm8 = vcmp.lt.s32.totalorder %v1305_v7, 16  ;;  %v456_v7 = vld [vmem:[%s218_s6] sm:$0xf]  ;;  %vm485_vm9 = vcmask 588800  }
  0x7b   : > { %386 = vrot.lane.b32.xlu1 %v1289_v3, %s1056_s12  ;;  %434 = vrot.lane.b32.xlu0 %v1289_v3, %s1057_s28 }
  0x7f   : > { %410 = vrot.lane.b32.xlu1 %v1289_v3, %s1058_s23  ;;  %408 = vrot.lane.b32.xlu0 %v1285_v2, %s1058_s23 }
  0x83   : > { %362 = vrot.lane.b32.xlu1 %v1289_v3, %s1059_s29  ;;  %360 = vrot.lane.b32.xlu0 %v1285_v2, %s1059_s29 }
  0x87   : > { %312 = vrot.lane.b32.xlu1 %v1289_v3, %s1060_s5  ;;  %310 = vrot.lane.b32.xlu0 %v1285_v2, %s1060_s5 }
  0x8b   : > { %336 = vrot.lane.b32.xlu1 %v1289_v3, %s1061_s0  ;;  %334 = vrot.lane.b32.xlu0 %v1285_v2, %s1061_s0 }
  0x8f   : > { %263 = vrot.lane.b32.xlu1 %v1289_v3, %s1063_s30  ;;  %261 = vrot.lane.b32.xlu0 %v1285_v2, %s1063_s30 }
  0x93   : > { %288 = vrot.lane.b32.xlu1 %v1289_v3, %s1064_s10  ;;  %286 = vrot.lane.b32.xlu0 %v1285_v2, %s1064_s10 }
  0xe9   : > { %v385_v11 = vpop.permute.xlu1 %384  ;;  %v433_v12 = vpop.permute.xlu0 %432 }
  0xed   : > { %v387_v18 = vpop.permute.xlu1 %386  ;;  %v435_v19 = vpop.permute.xlu0 %434 }
  0xee   : > { %v437_v21 = vsel %vm436_vm0, %v433_v12, %v435_v19  ;;  %v438_v22 = vsel %vm436_vm0, %v435_v19, %v433_v12  ;;  %v389_v25 = vsel %vm388_vm1, %v385_v11, %v387_v18  ;;  %v390_v29 = vsel %vm388_vm1, %v387_v18, %v385_v11  ;;  %v294_v11 = vld [vmem:[#allocation9 + $0x2] sm:$0x3] }
  0xef   : > { %v452_v26 = vmul.f32 %v445_v14, %v437_v21  ;;  %v453_v28 = vmul.f32 %v449_v16, %v438_v22  ;;  %v404_v35 = vmul.f32 %v397_v17, %v389_v25  ;;  %v405_v39 = vmul.f32 %v401_v20, %v390_v29 }
  0xf0   : > { %v275_v16 = vrot.slane %v270_v10, %v1307_v8  ;;  %v279_v17 = vrot.slane %v270_v10, %v1309_v9  ;;  %v299_v18 = vrot.slane %v294_v11, %v1307_v8  ;;  %v303_v19 = vrot.slane %v294_v11, %v1309_v9 }
  0xf1   : > { %v411_v30 = vpop.permute.xlu1 %410  ;;  %v409_v31 = vpop.permute.xlu0 %408  ;;  %v484_v32 = vpack.c.bf16 %v453_v28, %v453_v28  ;;  %v483_v33 = vpack.c.bf16 %v452_v26, %v452_v26 }
  0xf2   : > { %v413_v36 = vsel %vm412_vm2, %v409_v31, %v411_v30  ;;  %v414_v37 = vsel %vm412_vm2, %v411_v30, %v409_v31 }
  0xf3   : > { %v428_v40 = vmul.f32 %v421_v23, %v413_v36  ;;  %v429_v41 = vmul.f32 %v425_v27, %v414_v37  ;;  %699 = vmatprep.subr.msk.bf16.mxu0 %vm489_vm3, %v484_v32  ;;  %v491_v42 = vsel %vm489_vm3, %v483_v33, 0 }
  0xf4   : > { %503 = vmatpush1.bf16.msra.mxu0 %v491_v42 }
  0xf5   : > { %v363_v43 = vpop.permute.xlu1 %362  ;;  %v361_v44 = vpop.permute.xlu0 %360  ;;  %v482_v45 = vpack.c.bf16 %v429_v41, %v405_v39  ;;  %v481_v46 = vpack.c.bf16 %v428_v40, %v404_v35 }
  0xf6   : > { %v365_v47 = vsel %vm364_vm4, %v361_v44, %v363_v43  ;;  %v366_v48 = vsel %vm364_vm4, %v363_v43, %v361_v44 }
  0xf7   : > { %v380_v49 = vmul.f32 %v373_v34, %v365_v47  ;;  %v381_v50 = vmul.f32 %v377_v38, %v366_v48  ;;  %504 = vmatprep.subr.bf16.mxu0 %v482_v45 }
  0xf8   : > { %505 = vmatpush1.bf16.msra.mxu0 %v481_v46 }
  0xf9   : > { %v313_v53 = vpop.permute.xlu1 %312  ;;  %v311_v54 = vpop.permute.xlu0 %310  ;;  %v480_v55 = vpack.c.bf16 %v381_v50, %v1289_v3  ;;  %v479_v56 = vpack.c.bf16 %v380_v49, %v1285_v2 }
  0xfa   : > { %v315_v61 = vsel %vm314_vm5, %v311_v54, %v313_v53  ;;  %v316_v62 = vsel %vm314_vm5, %v313_v53, %v311_v54 }
  0xfb   : > { %506 = vmatprep.subr.bf16.mxu0 %v480_v55  ;;  %v330_v4 = vmul.f32 %v323_v57, %v316_v62  ;;  %v331_v2 = vmul.f32 %v327_v58, %v315_v61 }
  0xfc   : > { %507 = vmatpush1.bf16.msra.mxu0 %v479_v56 }
  0xfd   : > { %v337_v63 = vpop.permute.xlu1 %336  ;;  %v335_v0 = vpop.permute.xlu0 %334 }
  0xfe   : > { %v339_v1 = vsel %vm338_vm6, %v335_v0, %v337_v63  ;;  %v340_v3 = vsel %vm338_vm6, %v337_v63, %v335_v0 }
  0xff   : > { %v354_v5 = vmul.f32 %v347_v59, %v340_v3  ;;  %v355_v6 = vmul.f32 %v351_v60, %v339_v1 }
 0x101   : > { %v264_v12 = vpop.permute.xlu1 %263  ;;  %v262_v13 = vpop.permute.xlu0 %261  ;;  %v478_v14 = vpack.c.bf16 %v355_v6, %v331_v2  ;;  %v477_v15 = vpack.c.bf16 %v354_v5, %v330_v4 }
 0x102   : > { %v268_v20 = vsel %vm267_vm7, %v262_v13, %v264_v12  ;;  %v269_v21 = vsel %vm267_vm7, %v264_v12, %v262_v13 }
 0x103   : > { %508 = vmatprep.subr.bf16.mxu0 %v478_v14  ;;  %v282_v26 = vmul.f32 %v275_v16, %v269_v21  ;;  %v283_v27 = vmul.f32 %v279_v17, %v268_v20 }
 0x104   : > { %509 = vmatpush1.bf16.msra.mxu0 %v477_v15 }
 0x105   : > { %v289_v22 = vpop.permute.xlu1 %288  ;;  %v287_v23 = vpop.permute.xlu0 %286 }
 0x106   : > { %v291_v24 = vsel %vm290_vm8, %v287_v23, %v289_v22  ;;  %v292_v25 = vsel %vm290_vm8, %v289_v22, %v287_v23 }
 0x107   : > { %v306_v28 = vmul.f32 %v299_v18, %v292_v25  ;;  %v307_v29 = vmul.f32 %v303_v19, %v291_v24 }
 0x109   : > { %v476_v30 = vpack.c.bf16 %v307_v29, %v283_v27  ;;  %v475_v31 = vpack.c.bf16 %v306_v28, %v282_v26 }
 0x10b   : > { %510 = vmatprep.subr.bf16.mxu0 %v476_v30 }
 0x10c   : > { %511 = vmatpush1.bf16.msra.mxu0 %v475_v31 }
 0x10f   : > { %700 = vmatmul.mubr.msk.bf16.vlgmr.msra.gmra.mxu0 %vm485_vm9, %v456_v7 }
 0x1cf   : > { %v530_v8 = vpop.f32.mrf.mxu0 }
 0x1d1   : > { %v532_v9 = vpop.f32.mrf.mxu0  ;;  %540 = sbr.rel (%p701_p5) target bundleno = 471 (0x1d7), region = 52 }
 0x1d3   : > { %v534_v32 = vpop.f32.mrf.mxu0 }
 0x1d5   : > { %v535_v33 = vpop.f32.mrf.mxu0 }
 0x1d6   : > { %541 = vst [vmem:[#allocation2] sm:$0xff] %v530_v8  ;;  %542 = vst [vmem:[#allocation2 + $0x8] sm:$0xff] %v532_v9 }
 0x1d7 PF: > { %p702_p11 = scmp.ne.s32.totalorder %s1033_s18, 1 }
 0x1d9   : > { %546 = sbr.rel (%p702_p11) target bundleno = 484 (0x1e4), region = 56 }
 0x1de   : > { %v547_v34 = vld [vmem:[%s1261_s4] sm:$0xff]  ;;  %v548_v35 = vld [vmem:[%s1261_s4 + $0x8] sm:$0xff] }
 0x1df   : > { %v549_v36 = vadd.f32 %v547_v34, %v530_v8  ;;  %v550_v37 = vadd.f32 %v548_v35, %v532_v9 }
 0x1e1   : > { %v551_v38 = vmax.f32 %v549_v36, 0.0  ;;  %v552_v39 = vmax.f32 %v550_v37, 0.0 }
 0x1e3   : > { %553 = vst [vmem:[%s1280_s8] sm:$0xff] %v551_v38  ;;  %554 = vst [vmem:[%s1280_s8 + $0x8] sm:$0xff] %v552_v39 }
 0x1e4 PF: > { %s709_s7 = sshll.u32 %s1037_s19, 8  ;;  %s1441_s24 = sld [smem:[#allocation20_spill]] }
 0x1e5   : > { %s570_s26 = sshll.u32 %s1280_s8, 4  ;;  %s556_s6 = scalar_lea.sflag [#allocation6], %s1257_s15  ;;  %s571_s26 = int_to_ptr.vmem [resolvable:$true] %s570_s26 }
 0x1e6   : > { %s921_s4 = scalar_lea.vmem %s571_s26, 256  ;;  %p1442_p7 = scmp.ne.s32.totalorder %s1426_s9, 0 }
 0x1e7   : > { %p922_p4 = scmp.ne.s32.totalorder %s571_s26, %s921_s4  ;;  %s1065_s12 = smov [#allocation10]  }
 0x1e8   : > { %s925_s28 = sshll.u32 %s1065_s12, 4  ;;  %s926_s28 = int_to_ptr.vmem [resolvable:$false] %s925_s28 }
 0x1e9   : > { %p923_p2 = pnand %p922_p4, %p1442_p7  ;;  %s927_s23 = scalar_lea.vmem %s926_s28, 512 }
 0x1ea   : > { %s568_s2 = scalar_lea.hbm %s1441_s24, %s709_s7  ;;  %p928_p0 = scmp.lt.s32.totalorder %s571_s26, %s926_s28 }
 0x1eb   : > { %p924_p13 = pneg %p923_p2  ;;  %p929_p12 = scmp.lt.s32.totalorder %s927_s23, %s921_s4 }
 0x1ed   : > { %p930_p6 = por %p929_p12, %p928_p0 }
 0x1ef   : > { %p931_p8 = pnand %p930_p6, %p924_p13 }
 0x1f1   : > { %934 = shalt.err (!%p931_p8)
}
 0x1f2   : > { %s935_s19 = scalar_lea.hbm %s568_s2, 256  ;;  %s939_s29 = scalar_lea.hbm %s1441_s24, 512 }
 0x1f3   : > { %p936_p1 = scmp.ne.s32.totalorder %s568_s2, %s935_s19  ;;  %p940_p10 = scmp.lt.s32.totalorder %s568_s2, %s1441_s24 }
 0x1f4   : > { %p941_p5 = scmp.lt.s32.totalorder %s939_s29, %s935_s19 }
 0x1f5   : > { %p937_p3 = pnand %p936_p1, %p1442_p7 }
 0x1f6   : > { %p942_p11 = por %p941_p5, %p940_p10 }
 0x1f7   : > { %p938_p9 = pneg %p937_p3 }
 0x1f9   : > { %p943_p4 = pnand %p942_p11, %p938_p9 }
 0x1fb   : > { %946 = shalt.err (!%p943_p4)
}
 0x1fc   : > { %718 = dma.vmem_to_hbm [thread:$0]  (%p1442_p7), %s571_s26, 256, %s568_s2, %s556_s6  }
 0x1fd PF: > { %s1443_s30 = sld [smem:[#allocation15_spill]]  ;;  %p738_p2 = scmp.ge.s32.totalorder %s1049_s22, 2 }
 0x1fe   : > { %s1444_s10 = sld [smem:[#allocation16_spill]] }
 0x203   : > { %s582_s7 = sand.u32 1, %s1443_s30  }
 0x204   : > { %p1445_p13 = scmp.ne.s32.totalorder %s1444_s10, 0  ;;  %s583_s18 = scalar_lea.sflag [#allocation6], %s582_s7 }
 0x206   : > { %p732_p0 = pnand %p738_p2, %p1445_p13 }
 0x208   : > { %p733_p12 = pneg %p732_p0 }
 0x20a   : > { %1004 = dma.done.wait (%p733_p12), %s583_s18, 256  }
 0x20b   : > { %1006 = vsyncadd (%p733_p12), %s583_s18, 4294967040  ;;  %s22_s22 = sadd.s32 1, %s1049_s22   ;;  %s1446_s9 = sld [smem:[#allocation17_spill]] }
 0x20c   : > { %p19_p6 = scmp.ge.s32.totalorder %s22_s22, 6   ;;  %s1447_s12 = smov %s1013_s13 }
 0x20d   : > { %s1448_s13 = smov %s1017_s14  ;;  %s1449_s14 = smov %s1228_s27 }
 0x20e   : > { %s1450_s15 = smov %s1025_s16  ;;  %s1451_s16 = smov %s1029_s17 }
 0x20f   : > { %s1452_s17 = smov %s1237_s25  ;;  %s1453_s18 = smov %s1041_s20 }
 0x210   : > { %s1454_s19 = smov %s1045_s21  ;;  %s1456_s21 = smov %s1462_s11 }
 0x211   : > { %s1455_s20 = smov %s1446_s9  ;;  %21 = sbr.rel (!%p19_p6) target bundleno = 15 (0xf), region = 113 }
 0x216   :  { %588 = vsyncpa [#allocation5], 1 }
 0x217   :  { %590 = vsyncpa [#allocation5 + $0x1], 1 }
 0x218   :  { %591 = vsyncpa [#allocation8], 1 }
 0x219   :  { %593 = vsyncpa [#allocation8 + $0x1], 1 }
 0x21a   :  { %594 = vsyncpa [#allocation6], 1 }
 0x21b   :  { %596 = vsyncpa [#allocation6 + $0x1], 1 }

</bundles_post_ra>
